<compile_context>
chip_gen: v7x
topology: tpu7x:2x2x1
jax: 0.10.0
libtpu: 0.0.40
codegen_flags: <defaults>
</compile_context>

<pallas_src>
import jax
import jax.numpy as jnp
from jax.experimental import pallas as pl
from jax.experimental.pallas import tpu as pltpu


def _round_up(a, m):
    return ((a + m - 1) // m) * m


def _round_down(a, m):
    return (a // m) * m


def _sublane_pack(itemsize):
    # rows-per-vreg packing along the second-to-last (sublane) dim.
    return {4: 8, 2: 16, 1: 32}.get(itemsize, 8)


# --------------------------------- kernels ----------------------------------

def _gate_planes_kernel(x_ref, w_ref, b_ref, o_ref):
    """x_ref/o_ref: (C, TR, 128).  Spatial is the last two (dense) dims."""
    x = x_ref[...]
    C = x.shape[0]
    # f32 gate accumulator; upcast one channel plane at a time (no full f32
    # copy of the (C, TR, 128) block -> lower vreg/VMEM pressure for bf16).
    acc = x[0].astype(jnp.float32) * w_ref[0]
    for c in range(1, C):
        acc = acc + x[c].astype(jnp.float32) * w_ref[c]
    gate = jax.nn.sigmoid(acc + b_ref[0])            # (TR, 128) f32, EUP sigmoid
    if x.dtype == jnp.float32:
        o_ref[...] = x * gate[None]
    else:
        # multiply at input width (bf16 VALU on v6e/v7x); the downcast of the
        # gate is the only extra rounding vs. an all-f32 reference.
        o_ref[...] = x * gate.astype(x.dtype)[None]


def _gate_flat_kernel(x_ref, w_ref, b_ref, o_ref):
    """Fallback layout (S % 128 != 0): x_ref/o_ref: (C, TS)."""
    x = x_ref[...]
    C = x.shape[0]
    acc = x[0:1, :].astype(jnp.float32) * w_ref[0]
    for c in range(1, C):
        acc = acc + x[c:c + 1, :].astype(jnp.float32) * w_ref[c]
    gate = jax.nn.sigmoid(acc + b_ref[0])            # (1, TS) f32
    if x.dtype == jnp.float32:
        o_ref[...] = x * gate
    else:
        o_ref[...] = x * gate.astype(x.dtype)


# --------------------------------- wrapper -----------------------------------

def spatial_gate3d(x, weight, bias, *, max_block_bytes=4 * 1024 * 1024,
                   vmem_limit_bytes=48 * 1024 * 1024):
    """x: (N, C, D, H, W); weight: (1, C, 1, 1, 1); bias: (1,) — Conv3d layout."""
    N, C, D, H, W = x.shape
    S = D * H * W
    itemsize = jnp.dtype(x.dtype).itemsize
    pack = _sublane_pack(itemsize)

    # Metadata-only views: no transpose, no pad, no extra HBM traffic.
    w = weight.reshape(C).astype(jnp.float32)
    b = bias.reshape(1).astype(jnp.float32)

    cparams = pltpu.CompilerParams(
        dimension_semantics=("parallel", "parallel"),
        vmem_limit_bytes=vmem_limit_bytes)

    if S % 128 == 0:
        rows = S // 128
        x4 = x.reshape(N, C, rows, 128)
        # Largest (C, tr, 128) block under max_block_bytes; tr is a multiple of
        # the sublane pack (so block bytes are exact — no hidden padding) or
        # the full row extent.  Real VMEM ≈ 2x(in+out) blocks + f32 gate temps,
        # which stays well under vmem_limit_bytes at the 4 MiB default.
        tr_cap = max(pack,
                     _round_down(max_block_bytes // (C * 128 * itemsize), pack))
        tr = rows if rows <= tr_cap else tr_cap
        grid = (N, pl.cdiv(rows, tr))

        out = pl.pallas_call(
            _gate_planes_kernel,
            out_shape=jax.ShapeDtypeStruct((N, C, rows, 128), x.dtype),
            grid=grid,
            in_specs=[
                pl.BlockSpec((None, C, tr, 128), lambda n, s: (n, 0, s, 0)),
                pl.BlockSpec((C,), lambda n, s: (0,), memory_space=pltpu.SMEM),
                pl.BlockSpec((1,), lambda n, s: (0,), memory_space=pltpu.SMEM),
            ],
            out_specs=pl.BlockSpec((None, C, tr, 128), lambda n, s: (n, 0, s, 0)),
            compiler_params=cparams,
        )(x4, w, b)
        return out.reshape(N, C, D, H, W)

    # -------- fallback: S not a multiple of 128 (masked tail stores) --------
    x3 = x.reshape(N, C, S)
    c_pad = _round_up(C, pack)                       # channel axis pads on sublanes
    ts = max(128, _round_down(max_block_bytes // (c_pad * itemsize), 128))
    ts = min(ts, _round_up(S, 128))
    grid = (N, pl.cdiv(S, ts))

    out = pl.pallas_call(
        _gate_flat_kernel,
        out_shape=jax.ShapeDtypeStruct((N, C, S), x.dtype),
        grid=grid,
        in_specs=[
            pl.BlockSpec((None, C, ts), lambda n, s: (n, 0, s)),
            pl.BlockSpec((C,), lambda n, s: (0,), memory_space=pltpu.SMEM),
            pl.BlockSpec((1,), lambda n, s: (0,), memory_space=pltpu.SMEM),
        ],
        out_specs=pl.BlockSpec((None, C, ts), lambda n, s: (n, 0, s)),
        compiler_params=cparams,
    )(x3, w, b)
    return out.reshape(N, C, D, H, W)


def spatial_gate3d_ref(x, weight, bias):
    # Pure-JAX reference of the PyTorch forward.
    w = weight.reshape(-1).astype(jnp.float32)       # (C,)
    sqz = jnp.einsum("ncdhw,c->ndhw", x.astype(jnp.float32), w) + bias[0]
    gate = jax.nn.sigmoid(sqz)[:, None, :, :, :]     # (N,1,D,H,W)
    return (gate * x.astype(jnp.float32)).astype(x.dtype)


if __name__ == "__main__":
    key = jax.random.PRNGKey(0)
    kx, kw, kb, kx2 = jax.random.split(key, 4)

    # Main test: S = D*H*W = 256 (multiple of 128) -> dense-planes fast path.
    N, C, D, H, W = 2, 4, 4, 8, 8
    x = jax.random.normal(kx, (N, C, D, H, W), dtype=jnp.float32)

    # deterministic "Conv3d(channels, 1, kernel_size=1)" parameters
    weight = jax.random.normal(kw, (1, C, 1, 1, 1), dtype=jnp.float32) * 0.1
    bias = jax.random.normal(kb, (1,), dtype=jnp.float32) * 0.1

    out = jax.block_until_ready(spatial_gate3d(x, weight, bias))
    ref = spatial_gate3d_ref(x, weight, bias)
    assert out.shape == x.shape
    assert jnp.allclose(out, ref, atol=1e-5, rtol=1e-5), "mismatch vs reference"

    # Secondary test: S = 60 (not a multiple of 128) -> flat fallback path.
    N2, C2, D2, H2, W2 = 1, 3, 2, 5, 6
    x2 = jax.random.normal(kx2, (N2, C2, D2, H2, W2), dtype=jnp.float32)
    w2 = weight[:, :C2]
    out2 = jax.block_until_ready(spatial_gate3d(x2, w2, bias))
    ref2 = spatial_gate3d_ref(x2, w2, bias)
    assert out2.shape == x2.shape
    assert jnp.allclose(out2, ref2, atol=1e-5, rtol=1e-5), "mismatch (tail path)"

    print("KERNEL_OK")
</pallas_src>

<mosaic_0001>
module attributes {stable_mosaic.version = 11 : i64} {
  func.func @_gate_planes_kernel(%arg0: i32, %arg1: i32, %arg2: memref<1x4x2x128xf32, #tpu.memory_space<vmem>>, %arg3: memref<4xf32, #tpu.memory_space<smem>>, %arg4: memref<1xf32, #tpu.memory_space<smem>>, %arg5: memref<1x4x2x128xf32, #tpu.memory_space<vmem>>) attributes {dimension_semantics = [#tpu.dimension_semantics<parallel>, #tpu.dimension_semantics<parallel>], iteration_bounds = array<i64: 2, 1>, scalar_prefetch = 0 : i64, scratch_operands = 0 : i64, tpu.core_type = #tpu.core_type<tc>, window_params = [{transform_indices = @transform_0, window_bounds = array<i64: 1, 4, 2, 128>}, {transform_indices = @transform_1, window_bounds = array<i64: 4>}, {transform_indices = @transform_2, window_bounds = array<i64: 1>}, {transform_indices = @transform_3, window_bounds = array<i64: 1, 4, 2, 128>}]} {
    %c0 = arith.constant 0 : index
    %c0_0 = arith.constant 0 : index
    %c0_1 = arith.constant 0 : index
    %c0_2 = arith.constant 0 : index
    %0 = vector.load %arg2[%c0, %c0_0, %c0_1, %c0_2] : memref<1x4x2x128xf32, #tpu.memory_space<vmem>>, vector<1x4x2x128xf32>
    %1 = vector.shape_cast %0 : vector<1x4x2x128xf32> to vector<4x2x128xf32>
    %2 = vector.extract_strided_slice %1 {offsets = [0, 0, 0], sizes = [1, 2, 128], strides = [1, 1, 1]} : vector<4x2x128xf32> to vector<1x2x128xf32>
    %3 = vector.shape_cast %2 : vector<1x2x128xf32> to vector<2x128xf32>
    %c0_3 = arith.constant 0 : index
    %4 = memref.load %arg3[%c0_3] : memref<4xf32, #tpu.memory_space<smem>>
    %5 = vector.broadcast %4 : f32 to vector<2x128xf32>
    %6 = arith.mulf %3, %5 : vector<2x128xf32>
    %7 = vector.extract_strided_slice %1 {offsets = [1, 0, 0], sizes = [1, 2, 128], strides = [1, 1, 1]} : vector<4x2x128xf32> to vector<1x2x128xf32>
    %8 = vector.shape_cast %7 : vector<1x2x128xf32> to vector<2x128xf32>
    %c1 = arith.constant 1 : index
    %9 = memref.load %arg3[%c1] : memref<4xf32, #tpu.memory_space<smem>>
    %10 = vector.broadcast %9 : f32 to vector<2x128xf32>
    %11 = arith.mulf %8, %10 : vector<2x128xf32>
    %12 = arith.addf %6, %11 : vector<2x128xf32>
    %13 = vector.extract_strided_slice %1 {offsets = [2, 0, 0], sizes = [1, 2, 128], strides = [1, 1, 1]} : vector<4x2x128xf32> to vector<1x2x128xf32>
    %14 = vector.shape_cast %13 : vector<1x2x128xf32> to vector<2x128xf32>
    %c2 = arith.constant 2 : index
    %15 = memref.load %arg3[%c2] : memref<4xf32, #tpu.memory_space<smem>>
    %16 = vector.broadcast %15 : f32 to vector<2x128xf32>
    %17 = arith.mulf %14, %16 : vector<2x128xf32>
    %18 = arith.addf %12, %17 : vector<2x128xf32>
    %19 = vector.extract_strided_slice %1 {offsets = [3, 0, 0], sizes = [1, 2, 128], strides = [1, 1, 1]} : vector<4x2x128xf32> to vector<1x2x128xf32>
    %20 = vector.shape_cast %19 : vector<1x2x128xf32> to vector<2x128xf32>
    %c3 = arith.constant 3 : index
    %21 = memref.load %arg3[%c3] : memref<4xf32, #tpu.memory_space<smem>>
    %22 = vector.broadcast %21 : f32 to vector<2x128xf32>
    %23 = arith.mulf %20, %22 : vector<2x128xf32>
    %24 = arith.addf %18, %23 : vector<2x128xf32>
    %c0_4 = arith.constant 0 : index
    %25 = memref.load %arg4[%c0_4] : memref<1xf32, #tpu.memory_space<smem>>
    %26 = vector.broadcast %25 : f32 to vector<2x128xf32>
    %27 = arith.addf %24, %26 : vector<2x128xf32>
    %28 = arith.negf %27 : vector<2x128xf32>
    %29 = math.exp %28 : vector<2x128xf32>
    %cst = arith.constant 1.000000e+00 : f32
    %30 = vector.broadcast %cst : f32 to vector<2x128xf32>
    %31 = arith.addf %30, %29 : vector<2x128xf32>
    %32 = arith.divf %30, %31 : vector<2x128xf32>
    %33 = vector.shape_cast %32 : vector<2x128xf32> to vector<1x2x128xf32>
    %34 = vector.broadcast %33 : vector<1x2x128xf32> to vector<4x2x128xf32>
    %35 = arith.mulf %1, %34 : vector<4x2x128xf32>
    %c0_5 = arith.constant 0 : index
    %c0_6 = arith.constant 0 : index
    %c0_7 = arith.constant 0 : index
    %c0_8 = arith.constant 0 : index
    %36 = vector.load %arg5[%c0_5, %c0_6, %c0_7, %c0_8] : memref<1x4x2x128xf32, #tpu.memory_space<vmem>>, vector<1x4x2x128xf32>
    %37 = vector.shape_cast %36 : vector<1x4x2x128xf32> to vector<4x2x128xf32>
    %38 = vector.shape_cast %35 : vector<4x2x128xf32> to vector<1x4x2x128xf32>
    tpu.vector_store %arg5[%c0_5, %c0_6, %c0_7, %c0_8], %38 {strides = array<i32>} : memref<1x4x2x128xf32, #tpu.memory_space<vmem>>, vector<1x4x2x128xf32>,
    return
  }
  func.func @transform_0(%arg0: i32, %arg1: i32) -> (i32, i32, i32, i32) {
    %c0_i32 = arith.constant 0 : i32
    %c0_i32_0 = arith.constant 0 : i32
    %c0_i32_1 = arith.constant 0 : i32
    return %arg0, %c0_i32, %arg1, %c0_i32_0 : i32, i32, i32, i32
  }
  func.func @transform_1(%arg0: i32, %arg1: i32) -> i32 {
    %c0_i32 = arith.constant 0 : i32
    %c0_i32_0 = arith.constant 0 : i32
    return %c0_i32 : i32
  }
  func.func @transform_2(%arg0: i32, %arg1: i32) -> i32 {
    %c0_i32 = arith.constant 0 : i32
    %c0_i32_0 = arith.constant 0 : i32
    return %c0_i32 : i32
  }
  func.func @transform_3(%arg0: i32, %arg1: i32) -> (i32, i32, i32, i32) {
    %c0_i32 = arith.constant 0 : i32
    %c0_i32_0 = arith.constant 0 : i32
    %c0_i32_1 = arith.constant 0 : i32
    return %arg0, %c0_i32, %arg1, %c0_i32_0 : i32, i32, i32, i32
  }
}

</mosaic_0001>

<bundles_post_ra>
// kernel: tpu_custom_call.1
= control target key start
LH: loop header
LB: loop body
LE: loop exit
PB: predicated region body
PF: predicated region fallthrough
CT: control target
= control target key end

     0   :  { %s852_s0 = inlined_call_operand.hbm [shape: f32[2,4,2,128], index: 0, kind: input, shape index: {}]   ;;  %s853_s1 = inlined_call_operand.vmem [shape: f32[4], index: 1, kind: input, shape index: {}]   ;;  %s854_s2 = inlined_call_operand.<no memory space> [shape: f32[1], index: 2, kind: input, shape index: {}]   ;;  %s855_s3 = inlined_call_operand.hbm [shape: f32[2,4,2,128], index: 3, kind: output, shape index: {}]  }
   0x1   :  { %8 = sst [smem:[#allocation2]] %s854_s2 }
   0x2   :  { %9 = vsyncpa [#allocation4], 0 }
   0x3   :  { %11 = vsyncpa [#allocation4 + $0x1], 0 }
   0x4   :  { %12 = vsyncpa [#allocation6], 0 }
   0x5   :  { %13 = vsyncpa [#allocation5], 0 }
   0x6   :  { %15 = vsyncpa [#allocation5 + $0x1], 0  ;;  %s636_s14 = smov 0   ;;  %s638_s15 = smov 0  }
   0x7   :  { %s640_s16 = smov 0   ;;  %s642_s17 = smov 0  }
   0x8   :  { %s644_s18 = smov 0   ;;  %s646_s19 = smov 0  }
   0x9 LB: > { %s369_s2 = sadd.s32 4294967295, %s604_s19   ;;  %s370_s20 = sadd.s32 4294967294, %s604_s19   ;;  %s604_s19 = sphi %s646_s19, %s21_s19   ;;  %s600_s18 = sphi %s644_s18, %s878_s18   ;;  %s596_s17 = sphi %s642_s17, %s877_s17   ;;  %s592_s16 = sphi %s640_s16, %s876_s16   ;;  %s588_s15 = sphi %s638_s15, %s875_s15   ;;  %s584_s14 = sphi %s636_s14, %s874_s14  }
   0xa   : > { %s42_s21 = sadd.s32 1, %s592_s16  ;;  %p49_p0 = scmp.ne.s32.totalorder %s592_s16, %s588_s15 }
   0xb   : > { %p50_p1 = scmp.eq.s32.totalorder %s604_s19, 0  ;;  %p55_p2 = scmp.ne.s32.totalorder %s588_s15, %s584_s14 }
   0xc   : > { %p674_p3 = scmp.eq.s32.totalorder %s369_s2, 0  ;;  %p123_p4 = scmp.eq.s32.totalorder %s369_s2, 1 }
   0xd   : > { %p678_p5 = por %p50_p1, %p49_p0  ;;  %p129_p6 = scmp.eq.s32.totalorder %s370_s20, 1 }
   0xe   : > { %s860_s22 = scalar_select %p674_p3, 1, 0 }
   0xf   : > { %p684_p7 = por %p674_p3, %p55_p2  ;;  %p688_p8 = por %p123_p4, %p49_p0 }
  0x10   : > { %p692_p9 = por %p129_p6, %p55_p2  ;;  %p371_p10 = scmp.ge.s32.totalorder %s604_s19, 1 }
  0x11   : > { %s862_s24 = scalar_select %p684_p7, 1, 0 }
  0x12   : > { %s863_s25 = scalar_select %p688_p8, 1, 0 }
  0x13   : > { %s864_s26 = scalar_select %p692_p9, 1, 0 }
  0x14   : > { %p136_p11 = scmp.lt.s32.totalorder %s604_s19, 3  ;;  %s149_s29 = sshll.u32 %s853_s1, 4  ;;  %s150_s29 = int_to_ptr.vmem [resolvable:$true] %s149_s29 }
  0x15   : > { %p413_p0 = scmp.lt.s32.totalorder %s604_s19, 2  ;;  %s33_s6 = sadd.s32 1, %s600_s18 }
  0x16   : > { %p701_p12 = pnand %p371_p10, %p136_p11  ;;  %p722_p6 = scmp.ge.s32.totalorder %s33_s6, 2 }
  0x17   : > { %p711_p2 = pnand %p413_p0, %p678_p5  ;;  %s163_s8 = sand.u32 1, %s592_s16  }
  0x18   : > { %p400_p1 = pneg %p701_p12  ;;  %s473_s9 = scalar_lea.vmem %s150_s29, 16 }
  0x19   : > { %p474_p10 = scmp.ne.s32.totalorder %s150_s29, %s473_s9  ;;  %p481_p13 = scmp.lt.s32.totalorder %s150_s29, %s150_s29 }
  0x1a   : > { %p717_p4 = pnand %p400_p1, %p674_p3  ;;  %p482_p9 = scmp.lt.s32.totalorder %s473_s9, %s473_s9 }
  0x1c   : > { %p475_p11 = pneg %p717_p4  ;;  %p483_p8 = por %p482_p9, %p481_p13 }
  0x1e   : > { %p476_p5 = pnand %p475_p11, %p474_p10 }
  0x20   : > { %p477_p0 = pneg %p476_p5 }
  0x22   : > { %p484_p1 = pnand %p483_p8, %p477_p0 }
  0x24   : > { %487 = shalt.err (!%p484_p1)
}
  0x25   : > { %s606_s10 = smov [#allocation7]   ;;  %s880_s6 = smov (%p722_p6, %s33_s6), 0 }
  0x26   : > { %403 = dma.vmem_to_smem (!%p717_p4), %s150_s29, 16, %s606_s10, [#allocation6]  }
  0x27   : > { %s374_s11 = sshll.u32 %s163_s8, 3  ;;  %s37_s12 = ssub.s32 %s600_s18, %s880_s6 }
  0x28   : > { %p40_p9 = scmp.eq.s32.totalorder %s37_s12, 0  ;;  %s390_s13 = sshll.u32 %s600_s18, 7 }
  0x29   : > { %s741_s23 = scalar_lea.hbm %s852_s0, %s390_s13  ;;  %s167_s27 = scalar_lea.vmem [#allocation3], %s374_s11 }
  0x2a   : > { %s175_s28 = sshll.u32 %s167_s27, 4  ;;  %s750_s5 = scalar_lea.sflag [#allocation4], %s163_s8  ;;  %s748_s28 = int_to_ptr.vmem [resolvable:$true] %s175_s28 }
  0x2b   : > { %s746_s29 = scalar_select %p40_p9, %s592_s16, %s42_s21  }
  0x2c   : > { %s488_s7 = scalar_lea.hbm %s741_s23, 128  ;;  %p490_p13 = pneg %p711_p2 }
  0x2d   : > { %p489_p8 = scmp.ne.s32.totalorder %s741_s23, %s488_s7  ;;  %s493_s11 = scalar_lea.hbm %s852_s0, 256 }
  0x2e   : > { %p494_p10 = scmp.lt.u32.totalorder %s741_s23, %s852_s0  ;;  %p495_p11 = scmp.lt.u32.totalorder %s493_s11, %s488_s7 }
  0x2f   : > { %p491_p4 = pnand %p490_p13, %p489_p8  ;;  %p497_p0 = scmp.lt.u32.totalorder %s488_s7, %s741_s23 }
  0x30   : > { %p496_p5 = por %p495_p11, %p494_p10 }
  0x31   : > { %p492_p6 = pneg %p491_p4 }
  0x32   : > { %p498_p1 = por %p497_p0, %p496_p5 }
  0x34   : > { %p499_p9 = pnand %p498_p1, %p492_p6 }
  0x36   : > { %502 = shalt.err (!%p499_p9)
}
  0x37   : > { %s503_s21 = scalar_lea.vmem %s748_s28, 128  ;;  %s607_s8 = smov [#allocation3]  }
  0x38   : > { %p504_p8 = scmp.ne.s32.totalorder %s748_s28, %s503_s21  ;;  %s508_s2 = sshll.u32 %s607_s8, 4  ;;  %s509_s2 = int_to_ptr.vmem [resolvable:$false] %s508_s2 }
  0x39   : > { %s510_s20 = scalar_lea.vmem %s509_s2, 256  ;;  %p511_p7 = scmp.lt.s32.totalorder %s748_s28, %s509_s2 }
  0x3a   : > { %p506_p4 = pnand %p504_p8, %p490_p13  ;;  %p512_p10 = scmp.lt.s32.totalorder %s510_s20, %s503_s21 }
  0x3c   : > { %p507_p3 = pneg %p506_p4  ;;  %p513_p11 = por %p512_p10, %p511_p7 }
  0x3e   : > { %p514_p5 = pnand %p513_p11, %p507_p3 }
  0x40   : > { %517 = shalt.err (!%p514_p5)
}
  0x41   : > { %s608_s27 = smov 32   ;;  %s609_s7 = smov 2  }
  0x42   : > { %407 = dma.hbm_to_vmem [thread:$0]  (!%p711_p2), %s741_s23, 128, %s748_s28, %s750_s5, %s608_s27, %s608_s27, %s609_s7  }
  0x43   : > { %187 = sbr.rel (%p701_p12) target bundleno = 141 (0x8d), region = 32  ;;  %s781_s9 = sand.u32 (!%p701_p12), 1, %s588_s15  }
  0x44   : > { %s378_s10 = sshll.u32 (!%p701_p12), %s781_s9, 3  ;;  %s190_s11 = scalar_lea.sflag (!%p701_p12), [#allocation4], %s781_s9 }
  0x45   : > { %s193_s12 = scalar_lea.vmem (!%p701_p12), [#allocation3], %s378_s10  ;;  %p869_p3 = scmp.ne.s32.totalorder (!%p701_p12), %s862_s24, 0 }
  0x4a   : > { %571 = dma.done.wait (%p869_p3), %s190_s11, 128  }
  0x4b   : > { %573 = vsyncadd (%p869_p3), %s190_s11, 4294967168  ;;  %p870_p7 = scmp.ne.s32.totalorder %s860_s22, 0 }
  0x4d   : > { %575 = dma.done.wait (%p870_p7), [#allocation6], 16  }
  0x4e   : > { %577 = vsyncadd (%p870_p7), [#allocation6], 4294967280 }
  0x4f   : > { %202 = sfence }
  0x50   : > { %s225_s30 = sld [smem:[#allocation7]]  ;;  %s381_s4 = sld [smem:[#allocation7 + $0x1]]  ;;  %v221_v0 = vld [vmem:[%s193_s12] sm:$0x3]  ;;  %v222_v1 = vld [vmem:[%s193_s12 + $0x2] sm:$0x3] }
  0x51   : > { %s382_s23 = sld [smem:[#allocation7 + $0x2]]  ;;  %s383_s28 = sld [smem:[#allocation7 + $0x3]]  ;;  %v223_v2 = vld [vmem:[%s193_s12 + $0x4] sm:$0x3]  ;;  %v224_v4 = vld [vmem:[%s193_s12 + $0x6] sm:$0x3] }
  0x52   : > { %s240_s5 = sld [smem:[#allocation2]]  ;;  %s220_s22 = scalar_lea.vmem [#allocation8], %s378_s10 }
  0x53   : > { %s272_s24 = sshll.u32 %s220_s22, 4  ;;  %s391_s13 = sshll.u32 %s596_s17, 7  ;;  %s798_s24 = int_to_ptr.vmem [resolvable:$true] %s272_s24 }
  0x54   : > { %s803_s2 = scalar_lea.hbm %s855_s3, %s391_s13  ;;  %s258_s17 = scalar_lea.sflag [#allocation5], %s781_s9 }
  0x55   : > { %s518_s20 = scalar_lea.vmem %s798_s24, 128  ;;  %p871_p2 = scmp.ne.s32.totalorder %s863_s25, 0 }
  0x56   : > { %v226_v3 = vstv %s225_s30  ;;  %v229_v6 = vstv %s381_s4  ;;  %p519_p12 = scmp.ne.s32.totalorder %s798_s24, %s518_s20  ;;  %s610_s27 = smov [#allocation8]  }
  0x57   : > { %v227_v5 = vmul.f32 %v226_v3, %v221_v0  ;;  %v233_v7 = vstv %s382_s23  ;;  %v230_v8 = vmul.f32 %v229_v6, %v222_v1  ;;  %v237_v10 = vstv %s383_s28  ;;  %s522_s7 = sshll.u32 %s610_s27, 4  ;;  %s523_s7 = int_to_ptr.vmem [resolvable:$false] %s522_s7 }
  0x58   : > { %v234_v9 = vmul.f32 %v233_v7, %v223_v2  ;;  %v238_v12 = vmul.f32 %v237_v10, %v224_v4  ;;  %v241_v14 = vstv %s240_s5  ;;  %p520_p13 = pnand %p519_p12, %p871_p2  ;;  %s524_s10 = scalar_lea.vmem %s523_s7, 256 }
  0x59   : > { %v231_v11 = vadd.f32 %v230_v8, %v227_v5  ;;  %p525_p0 = scmp.lt.s32.totalorder %s798_s24, %s523_s7  ;;  %p526_p1 = scmp.lt.s32.totalorder %s524_s10, %s518_s20 }
  0x5a   : > { %p521_p6 = pneg %p520_p13 }
  0x5b   : > { %v235_v13 = vadd.f32 %v234_v9, %v231_v11  ;;  %p527_p9 = por %p526_p1, %p525_p0 }
  0x5d   : > { %v239_v15 = vadd.f32 %v238_v12, %v235_v13  ;;  %p528_p8 = pnand %p527_p9, %p521_p6 }
  0x5f   : > { %v242_v16 = vadd.f32 %v241_v14, %v239_v15 }
  0x61   : > { %v384_v17 = vmul.f32 -1.442695, %v242_v16 }
  0x63   : > { %469 = vpow2.f32 %v384_v17 }
  0x6d   : > { %v470_v18 = vpop.eup %469 }
  0x6e   : > { %v246_v19 = vadd.f32 1.0, %v470_v18 }
  0x70   : > { %471 = vrcp.f32 %v246_v19 }
  0x7a   : > { %v472_v20 = vpop.eup %471 }
  0x7b   : > { %v249_v21 = vmul.f32 %v472_v20, %v221_v0  ;;  %v250_v22 = vmul.f32 %v472_v20, %v222_v1  ;;  %v251_v23 = vmul.f32 %v472_v20, %v223_v2  ;;  %v252_v24 = vmul.f32 %v472_v20, %v224_v4 }
  0x7d   : > { %253 = vst [vmem:[%s220_s22] sm:$0x3] %v249_v21  ;;  %254 = vst [vmem:[%s220_s22 + $0x2] sm:$0x3] %v250_v22 }
  0x7e   : > { %255 = vst [vmem:[%s220_s22 + $0x4] sm:$0x3] %v251_v23  ;;  %256 = vst [vmem:[%s220_s22 + $0x6] sm:$0x3] %v252_v24 }
  0x7f   : > { %531 = shalt.err (!%p528_p8)
}
  0x80   : > { %s532_s11 = scalar_lea.hbm %s803_s2, 128  ;;  %s536_s4 = scalar_lea.hbm %s855_s3, 256 }
  0x81   : > { %p533_p4 = scmp.ne.s32.totalorder %s803_s2, %s532_s11  ;;  %p537_p5 = scmp.lt.u32.totalorder %s803_s2, %s855_s3 }
  0x82   : > { %p538_p3 = scmp.lt.u32.totalorder %s536_s4, %s532_s11  ;;  %p540_p12 = scmp.lt.u32.totalorder %s532_s11, %s803_s2 }
  0x83   : > { %p534_p10 = pnand %p533_p4, %p871_p2 }
  0x84   : > { %p539_p7 = por %p538_p3, %p537_p5 }
  0x85   : > { %p535_p11 = pneg %p534_p10 }
  0x86   : > { %p541_p13 = por %p540_p12, %p539_p7 }
  0x88   : > { %p542_p6 = pnand %p541_p13, %p535_p11 }
  0x8a   : > { %545 = shalt.err (!%p542_p6)
}
  0x8b   : > { %s611_s5 = smov 32   ;;  %s612_s22 = smov 2  }
  0x8c   : > { %398 = dma.vmem_to_hbm [thread:$0]  (%p871_p2), %s798_s24, 128, %s803_s2, %s258_s17, %s611_s5, %s611_s5, %s612_s22  }
  0x8d PF: > { %s287_s13 = sand.u32 1, %s584_s14   ;;  %p872_p0 = scmp.ne.s32.totalorder %s864_s26, 0 }
  0x8e   : > { %p873_p1 = scmp.ge.s32.totalorder %s604_s19, 2  ;;  %s288_s21 = scalar_lea.sflag [#allocation5], %s287_s13 }
  0x90   : > { %p409_p9 = pnand %p873_p1, %p872_p0 }
  0x92   : > { %579 = dma.done.wait (!%p409_p9), %s288_s21, 128  }
  0x93   : > { %581 = vsyncadd (!%p409_p9), %s288_s21, 4294967168  ;;  %s21_s19 = sadd.s32 1, %s604_s19   ;;  %s874_s14 = smov %s588_s15 }
  0x94   : > { %p18_p8 = scmp.ge.s32.totalorder %s21_s19, 4   ;;  %s875_s15 = smov %s592_s16 }
  0x95   : > { %s876_s16 = smov %s746_s29  ;;  %s877_s17 = smov %s600_s18 }
  0x96   : > { %s878_s18 = smov %s880_s6  ;;  %20 = sbr.rel (!%p18_p8) target bundleno = 9 (0x9), region = 82 }
  0x9d   :  { %293 = vsyncpa [#allocation4], 1 }
  0x9e   :  { %295 = vsyncpa [#allocation4 + $0x1], 1 }
  0x9f   :  { %296 = vsyncpa [#allocation5], 1 }
  0xa0   :  { %298 = vsyncpa [#allocation5 + $0x1], 1 }
  0xa1   :  { %299 = vsyncpa [#allocation6], 1 }
  0xa2   :  { %301 = vsyncpa [#allocation6 + $0x1], 1 }

</bundles_post_ra>
